<compile_context>
chip_gen: v6e
topology: v6e:2x2x1
jax: 0.10.0
libtpu: 0.0.40
codegen_flags: <defaults>
</compile_context>

<pallas_src>
import functools

import jax
import jax.numpy as jnp
from jax import lax
from jax.experimental import pallas as pl
from jax.experimental.pallas import tpu as pltpu


def _round_up(x, m):
    return (x + m - 1) // m * m


def _causal_conv1d_kernel(*refs, kernel_size, dilation, pad, hb, carry,
                          use_stack):
    """One (batch, time-tile) grid step.

    Ref layout (depends on static flags):
      inputs : w, [halo_in (if pad>0 and not carry)], x
      outputs: o
      scratch: [halo (if pad>0 and carry)], [stack (if use_stack)]
    """
    it = iter(refs)
    w_ref = next(it)
    halo_in_ref = next(it) if (pad > 0 and not carry) else None
    x_ref = next(it)
    o_ref = next(it)
    halo_scr_ref = next(it) if (pad > 0 and carry) else None
    stack_ref = next(it) if use_stack else None

    j = pl.program_id(1)
    xc = x_ref[...]                       # (C_in_p, TT) current time tile
    c_in_p, tt = xc.shape

    halo = None
    lane_hb = None
    if pad > 0:
        if carry:
            # Carried halo: zero once per batch row (first time tile only).
            @pl.when(j == 0)
            def _zero_halo():
                halo_scr_ref[...] = jnp.zeros_like(halo_scr_ref)
            halo = halo_scr_ref[...]
        else:
            h = halo_in_ref[...]
            # First tile's halo lies before t=0 -> causal zeros (narrow select).
            halo = jnp.where(j > 0, h, jnp.zeros_like(h))
        lane_hb = lax.broadcasted_iota(jnp.int32, (c_in_p, hb), 1)

    def build_tap(off):
        # Window x[:, t_global - off]; the first `off` lanes come from the
        # narrow halo, the rest from xc rolled by `off`.
        if off == 0:
            return xc
        xc_r = pltpu.roll(xc, shift=off, axis=1)
        halo_r = pltpu.roll(halo, shift=off, axis=1)
        head = jnp.where(lane_hb < off, halo_r, xc_r[:, :hb])
        if hb < tt:
            return jnp.concatenate([head, xc_r[:, hb:]], axis=1)
        return head

    if use_stack:
        # im2col stack contained in a VMEM scratch, then one MXU matmul.
        for kk in range(kernel_size):
            off = pad - kk * dilation
            stack_ref[pl.ds(kk * c_in_p, c_in_p), :] = build_tap(off)
        if pad > 0 and carry:
            halo_scr_ref[...] = xc[:, tt - hb:]     # halo for the next tile
        acc = jnp.dot(w_ref[...], stack_ref[...],
                      preferred_element_type=jnp.float32)
    else:
        # Wide-channel fallback: per-tap matmul accumulation (no big stack).
        acc = None
        for kk in range(kernel_size):
            off = pad - kk * dilation
            part = jnp.dot(w_ref[kk], build_tap(off),
                           preferred_element_type=jnp.float32)
            acc = part if acc is None else acc + part
        if pad > 0 and carry:
            halo_scr_ref[...] = xc[:, tt - hb:]

    o_ref[...] = acc.astype(o_ref.dtype)


def _pick_hw_config():
    try:
        info = pltpu.get_tpu_info()
        vmem_phys = int(getattr(info, "vmem_capacity_bytes", 0))
    except Exception:
        vmem_phys = 0
    if vmem_phys >= 96 * 1024 * 1024:        # v5e / v6e: 128 MiB physical VMEM
        return 64 * 1024 * 1024, 1024
    if vmem_phys > 0:                         # v7x: 64 MiB per TensorCore
        return 48 * 1024 * 1024, 512
    return 32 * 1024 * 1024, 512              # unknown: conservative


def causal_conv1d(x, weight, dilation=1, *, time_tile=None, compute_dtype=None):
    """Causal 1-D conv. x: (N, C_in, T); weight: (C_out, C_in, K) -> (N, C_out, T)."""
    n, c_in, t = x.shape
    c_out, c_in_w, k = weight.shape
    assert c_in == c_in_w, (c_in, c_in_w)
    assert k >= 1 and dilation >= 1
    pad = (k - 1) * dilation
    out_dtype = jnp.dtype(x.dtype)

    # Compute dtype defaults to x.dtype: no extra HBM cast pass unless asked.
    cdt = jnp.dtype(compute_dtype) if compute_dtype is not None else jnp.dtype(x.dtype)
    sublane = {4: 8, 2: 16, 1: 32}[cdt.itemsize]

    c_in_p = _round_up(c_in, sublane)        # sublane-aligned im2col row blocks
    c_out_p = _round_up(c_out, 8)            # dense output stores (v5e: 1 vst slot)
    hb = _round_up(pad, 128) if pad > 0 else 0   # narrow, lane-aligned halo width

    vmem_limit, tt_cap = _pick_hw_config()
    if time_tile is not None:
        tt_cap = int(time_tile)

    # 128-aligned time tile, long enough to hold the causal halo, multiple of hb.
    tt = _round_up(min(tt_cap, _round_up(t, 128)), 128)
    if pad > 0:
        tt = _round_up(max(tt, hb), hb)

    # Halo strategy: carry in VMEM scratch (1.0x input traffic, time axis
    # "arbitrary") when n >= 2; otherwise a narrow halo input block so both
    # grid axes stay "parallel" (keeps v7x megacore busy when n == 1).
    carry = (pad > 0) and (n >= 2)

    itemsize = cdt.itemsize
    out_itemsize = out_dtype.itemsize
    stack_limit = 4 * 1024 * 1024

    def _est_vmem(tt_, use_stack_):
        b = 2 * c_in_p * tt_ * itemsize                       # x (double-buffered)
        b += 2 * c_out_p * k * c_in_p * itemsize              # resident weight
        b += 2 * c_out_p * tt_ * out_itemsize                 # output tile
        if pad > 0:
            b += (1 if carry else 2) * c_in_p * hb * itemsize
        if use_stack_:
            b += k * c_in_p * tt_ * itemsize                  # im2col scratch
        b += 3 * c_in_p * tt_ * itemsize + c_out_p * tt_ * 4  # live temporaries
        return b

    tt_min = max(hb, 128)
    budget = int(0.75 * vmem_limit)
    while True:
        use_stack = k * c_in_p * tt * itemsize <= stack_limit
        if tt <= tt_min or _est_vmem(tt, use_stack) <= budget:
            break
        nxt = max(tt_min, _round_up(tt // 2, hb if pad > 0 else 128))
        if nxt >= tt:
            break
        tt = nxt
    use_stack = k * c_in_p * tt * itemsize <= stack_limit
    assert pad <= tt, (pad, tt)              # halo must fit in ONE previous tile

    t_round = _round_up(t, tt)
    n_tiles = t_round // tt

    if t_round != t or c_in_p != c_in:
        x = jnp.pad(x, ((0, 0), (0, c_in_p - c_in), (0, t_round - t)))
    x = x.astype(cdt)

    w = weight.astype(cdt)
    if c_out_p != c_out or c_in_p != c_in:
        w = jnp.pad(w, ((0, c_out_p - c_out), (0, c_in_p - c_in), (0, 0)))
    if use_stack:
        # (C_out_p, K*C_in_p): taps folded into one MXU contraction.
        w_arr = jnp.transpose(w, (0, 2, 1)).reshape(c_out_p, k * c_in_p)
        w_spec = pl.BlockSpec((c_out_p, k * c_in_p), lambda b, j: (0, 0))
    else:
        # (K, C_out_p, C_in_p): per-tap matmul accumulation.
        w_arr = jnp.transpose(w, (2, 0, 1))
        w_spec = pl.BlockSpec((k, c_out_p, c_in_p), lambda b, j: (0, 0, 0))

    in_specs = [w_spec]
    inputs = [w_arr]
    if pad > 0 and not carry:
        blocks_per_tile = tt // hb
        in_specs.append(pl.BlockSpec(
            (pl.Squeezed(), c_in_p, hb),
            lambda b, j: (b, 0, jnp.maximum(j * blocks_per_tile - 1, 0))))
        inputs.append(x)
    in_specs.append(pl.BlockSpec((pl.Squeezed(), c_in_p, tt),
                                 lambda b, j: (b, 0, j)))
    inputs.append(x)

    scratch_shapes = []
    if pad > 0 and carry:
        scratch_shapes.append(pltpu.VMEM((c_in_p, hb), cdt))
    if use_stack:
        scratch_shapes.append(pltpu.VMEM((k * c_in_p, tt), cdt))

    dims = ("parallel", "arbitrary") if (pad > 0 and carry) else ("parallel", "parallel")

    kernel = functools.partial(
        _causal_conv1d_kernel, kernel_size=k, dilation=dilation, pad=pad,
        hb=hb, carry=carry, use_stack=use_stack)

    cost = pl.CostEstimate(
        flops=int(2 * n * t_round * c_out_p * k * c_in_p),
        transcendentals=0,
        bytes_accessed=int(int(x.size) * itemsize + int(w_arr.size) * itemsize
                           + n * c_out_p * t_round * out_itemsize))

    out = pl.pallas_call(
        kernel,
        out_shape=jax.ShapeDtypeStruct((n, c_out_p, t_round), out_dtype),
        grid_spec=pltpu.PrefetchScalarGridSpec(
            num_scalar_prefetch=0,
            grid=(n, n_tiles),
            in_specs=in_specs,
            out_specs=pl.BlockSpec((pl.Squeezed(), c_out_p, tt),
                                   lambda b, j: (b, 0, j)),
            scratch_shapes=scratch_shapes,
        ),
        compiler_params=pltpu.CompilerParams(
            dimension_semantics=dims,
            vmem_limit_bytes=vmem_limit,
        ),
        cost_estimate=cost,
    )(*inputs)

    return out[:, :c_out, :t]


def _reference(x, weight, dilation):
    # Pure-JAX reference mirroring the PyTorch module.
    k = weight.shape[-1]
    pad = (k - 1) * dilation
    out = lax.conv_general_dilated(
        x, weight,
        window_strides=(1,),
        padding=[(pad, pad)],
        rhs_dilation=(dilation,),
        dimension_numbers=("NCH", "OIH", "NCH"),
    )
    return out[:, :, :-pad] if pad else out


if __name__ == "__main__":
    key = jax.random.PRNGKey(0)
    kx, kw, kx2 = jax.random.split(key, 3)

    # --- Test 1: module-sized shapes (N=2, C_in=4, C_out=8, T=16, K=3, d=2) ---
    batch, in_channels, out_channels, seq_len = 2, 4, 8, 16
    kernel_size, dilation = 3, 2
    x = jax.random.normal(kx, (batch, in_channels, seq_len), dtype=jnp.float32)
    weight = jax.random.normal(
        kw, (out_channels, in_channels, kernel_size), dtype=jnp.float32) * 0.1
    ref = _reference(x, weight, dilation)

    out_f32 = jax.block_until_ready(causal_conv1d(x, weight, dilation=dilation))
    assert out_f32.shape == (batch, out_channels, seq_len), out_f32.shape
    assert jnp.allclose(out_f32, ref, atol=1e-4, rtol=1e-4), "fp32 mismatch vs reference"

    out_bf16 = jax.block_until_ready(
        causal_conv1d(x, weight, dilation=dilation, compute_dtype=jnp.bfloat16))
    assert jnp.allclose(out_bf16, ref, atol=3e-2, rtol=3e-2), "bf16 mismatch vs reference"

    # --- Test 2: multi-tile carried-halo route (N=2, T=300, tile=128) ---
    x2 = jax.random.normal(kx2, (2, in_channels, 300), dtype=jnp.float32)
    ref2 = _reference(x2, weight, dilation)
    out2 = jax.block_until_ready(
        causal_conv1d(x2, weight, dilation=dilation, time_tile=128))
    assert out2.shape == ref2.shape, out2.shape
    assert jnp.allclose(out2, ref2, atol=1e-4, rtol=1e-4), "multi-tile carry mismatch"

    # --- Test 3: multi-tile narrow-halo-input route (N=1 keeps time parallel) ---
    x3 = x2[:1]
    ref3 = _reference(x3, weight, dilation)
    out3 = jax.block_until_ready(
        causal_conv1d(x3, weight, dilation=dilation, time_tile=128))
    assert out3.shape == ref3.shape, out3.shape
    assert jnp.allclose(out3, ref3, atol=1e-4, rtol=1e-4), "halo-input route mismatch"

    print("KERNEL_OK")
</pallas_src>

<mosaic_0001>
module attributes {stable_mosaic.version = 11 : i64} {
  func.func @_causal_conv1d_kernel(%arg0: i32, %arg1: i32, %arg2: memref<8x24xf32, #tpu.memory_space<vmem>>, %arg3: memref<1x8x128xf32, #tpu.memory_space<vmem>>, %arg4: memref<1x8x128xf32, #tpu.memory_space<vmem>>, %arg5: memref<8x128xf32, #tpu.memory_space<vmem>>, %arg6: memref<24x128xf32, #tpu.memory_space<vmem>>) attributes {dimension_semantics = [#tpu.dimension_semantics<parallel>, #tpu.dimension_semantics<arbitrary>], iteration_bounds = array<i64: 2, 1>, scalar_prefetch = 0 : i64, scratch_operands = 2 : i64, tpu.core_type = #tpu.core_type<tc>, window_params = [{pipeline_mode = #tpu.pipeline_mode<synchronous>, transform_indices = @transform_0, window_bounds = array<i64: 8, 24>}, {transform_indices = @transform_1, window_bounds = array<i64: 1, 8, 128>}, {transform_indices = @transform_2, window_bounds = array<i64: 1, 8, 128>}]} {
    %c0 = arith.constant 0 : index
    %c0_0 = arith.constant 0 : index
    %c0_1 = arith.constant 0 : index
    %0 = vector.load %arg3[%c0, %c0_0, %c0_1] : memref<1x8x128xf32, #tpu.memory_space<vmem>>, vector<1x8x128xf32>
    %1 = vector.shape_cast %0 : vector<1x8x128xf32> to vector<8x128xf32>
    %c0_i32 = arith.constant 0 : i32
    %2 = arith.cmpi eq, %arg1, %c0_i32 : i32
    %3 = arith.extui %2 : i1 to i32
    %c0_i32_2 = arith.constant 0 : i32
    %4 = arith.cmpi ne, %3, %c0_i32_2 : i32
    scf.if %4 {
      %cst_22 = arith.constant 0.000000e+00 : f32
      %27 = vector.broadcast %cst_22 : f32 to vector<8x128xf32>
      %c0_23 = arith.constant 0 : index
      %c0_24 = arith.constant 0 : index
      %28 = vector.load %arg5[%c0_23, %c0_24] : memref<8x128xf32, #tpu.memory_space<vmem>>, vector<8x128xf32>
      tpu.vector_store %arg5[%c0_23, %c0_24], %27 {strides = array<i32>} : memref<8x128xf32, #tpu.memory_space<vmem>>, vector<8x128xf32>,
    } else {
    }
    %c0_3 = arith.constant 0 : index
    %c0_4 = arith.constant 0 : index
    %5 = vector.load %arg5[%c0_3, %c0_4] : memref<8x128xf32, #tpu.memory_space<vmem>>, vector<8x128xf32>
    %6 = tpu.iota {dimensions = array<i32: 1>} : vector<8x128xi32>
    %c4_i32 = arith.constant 4 : i32
    %7 = tpu.dynamic_rotate %1 by %c4_i32 dim 1 : vector<8x128xf32>, i32 -> vector<8x128xf32>
    %c4_i32_5 = arith.constant 4 : i32
    %8 = tpu.dynamic_rotate %5 by %c4_i32_5 dim 1 : vector<8x128xf32>, i32 -> vector<8x128xf32>
    %c4_i32_6 = arith.constant 4 : i32
    %9 = vector.broadcast %c4_i32_6 : i32 to vector<8x128xi32>
    %10 = arith.cmpi slt, %6, %9 : vector<8x128xi32>
    %11 = arith.select %10, %8, %7 : vector<8x128xi1>, vector<8x128xf32>
    %c0_7 = arith.constant 0 : index
    %c0_8 = arith.constant 0 : index
    %12 = vector.load %arg6[%c0_7, %c0_8] : memref<24x128xf32, #tpu.memory_space<vmem>>, vector<8x128xf32>
    tpu.vector_store %arg6[%c0_7, %c0_8], %11 {strides = array<i32>} : memref<24x128xf32, #tpu.memory_space<vmem>>, vector<8x128xf32>,
    %c2_i32 = arith.constant 2 : i32
    %13 = tpu.dynamic_rotate %1 by %c2_i32 dim 1 : vector<8x128xf32>, i32 -> vector<8x128xf32>
    %c2_i32_9 = arith.constant 2 : i32
    %14 = tpu.dynamic_rotate %5 by %c2_i32_9 dim 1 : vector<8x128xf32>, i32 -> vector<8x128xf32>
    %c2_i32_10 = arith.constant 2 : i32
    %15 = vector.broadcast %c2_i32_10 : i32 to vector<8x128xi32>
    %16 = arith.cmpi slt, %6, %15 : vector<8x128xi32>
    %17 = arith.select %16, %14, %13 : vector<8x128xi1>, vector<8x128xf32>
    %c8 = arith.constant 8 : index
    %c0_11 = arith.constant 0 : index
    %18 = vector.load %arg6[%c8, %c0_11] : memref<24x128xf32, #tpu.memory_space<vmem>>, vector<8x128xf32>
    tpu.vector_store %arg6[%c8, %c0_11], %17 {strides = array<i32>} : memref<24x128xf32, #tpu.memory_space<vmem>>, vector<8x128xf32>,
    %c16 = arith.constant 16 : index
    %c0_12 = arith.constant 0 : index
    %19 = vector.load %arg6[%c16, %c0_12] : memref<24x128xf32, #tpu.memory_space<vmem>>, vector<8x128xf32>
    tpu.vector_store %arg6[%c16, %c0_12], %1 {strides = array<i32>} : memref<24x128xf32, #tpu.memory_space<vmem>>, vector<8x128xf32>,
    %c0_13 = arith.constant 0 : index
    %c0_14 = arith.constant 0 : index
    %20 = vector.load %arg5[%c0_13, %c0_14] : memref<8x128xf32, #tpu.memory_space<vmem>>, vector<8x128xf32>
    tpu.vector_store %arg5[%c0_13, %c0_14], %1 {strides = array<i32>} : memref<8x128xf32, #tpu.memory_space<vmem>>, vector<8x128xf32>,
    %c0_15 = arith.constant 0 : index
    %c0_16 = arith.constant 0 : index
    %21 = vector.load %arg2[%c0_15, %c0_16] : memref<8x24xf32, #tpu.memory_space<vmem>>, vector<8x24xf32>
    %c0_17 = arith.constant 0 : index
    %c0_18 = arith.constant 0 : index
    %22 = vector.load %arg6[%c0_17, %c0_18] : memref<24x128xf32, #tpu.memory_space<vmem>>, vector<24x128xf32>
    %cst = arith.constant dense<0.000000e+00> : vector<8x128xf32>
    %23 = tpu.matmul %21, %22, %cst {dimension_numbers = #tpu.dot_dimension_numbers<[1], [0], [0], [1], [0, 0, 1, 1], [], []>} : vector<8x24xf32>, vector<24x128xf32>, vector<8x128xf32> -> vector<8x128xf32>
    %c0_19 = arith.constant 0 : index
    %c0_20 = arith.constant 0 : index
    %c0_21 = arith.constant 0 : index
    %24 = vector.load %arg4[%c0_19, %c0_20, %c0_21] : memref<1x8x128xf32, #tpu.memory_space<vmem>>, vector<1x8x128xf32>
    %25 = vector.shape_cast %24 : vector<1x8x128xf32> to vector<8x128xf32>
    %26 = vector.shape_cast %23 : vector<8x128xf32> to vector<1x8x128xf32>
    tpu.vector_store %arg4[%c0_19, %c0_20, %c0_21], %26 {strides = array<i32>} : memref<1x8x128xf32, #tpu.memory_space<vmem>>, vector<1x8x128xf32>,
    return
  }
  func.func @transform_0(%arg0: i32, %arg1: i32) -> (i32, i32) {
    %c0_i32 = arith.constant 0 : i32
    %c0_i32_0 = arith.constant 0 : i32
    %c0_i32_1 = arith.constant 0 : i32
    return %c0_i32, %c0_i32_0 : i32, i32
  }
  func.func @transform_1(%arg0: i32, %arg1: i32) -> (i32, i32, i32) {
    %c0_i32 = arith.constant 0 : i32
    %c0_i32_0 = arith.constant 0 : i32
    return %arg0, %c0_i32, %arg1 : i32, i32, i32
  }
  func.func @transform_2(%arg0: i32, %arg1: i32) -> (i32, i32, i32) {
    %c0_i32 = arith.constant 0 : i32
    %c0_i32_0 = arith.constant 0 : i32
    return %arg0, %c0_i32, %arg1 : i32, i32, i32
  }
}

</mosaic_0001>

<bundles_post_ra>
// kernel: tpu_custom_call.1
= control target key start
LH: loop header
LB: loop body
LE: loop exit
PB: predicated region body
PF: predicated region fallthrough
CT: control target
= control target key end

     0   :  { %7 = vsyncpa [#allocation5], 0  ;;  %s845_s0 = inlined_call_operand.hbm [shape: f32[8,24], index: 0, kind: input, shape index: {}]   ;;  %s846_s1 = inlined_call_operand.hbm [shape: f32[2,8,128], index: 1, kind: input, shape index: {}]   ;;  %s847_s2 = inlined_call_operand.hbm [shape: f32[2,8,128], index: 2, kind: output, shape index: {}]  }
   0x1   :  { %8 = vsyncpa [#allocation8], 0 }
   0x2   :  { %10 = vsyncpa [#allocation8 + $0x1], 0 }
   0x3   :  { %11 = vsyncpa [#allocation6], 0 }
   0x4   :  { %13 = vsyncpa [#allocation6 + $0x1], 0  ;;  %s668_s9 = smov 0   ;;  %s670_s10 = smov 0  }
   0x5   :  { %s672_s11 = smov 0   ;;  %s674_s12 = smov 0  }
   0x6   :  { %s676_s13 = smov 0   ;;  %s678_s14 = smov 0  }
   0x7 LB: > { %s400_s15 = sadd.s32 4294967295, %s644_s14   ;;  %s401_s16 = sadd.s32 4294967294, %s644_s14   ;;  %s644_s14 = sphi %s678_s14, %s19_s14   ;;  %s640_s13 = sphi %s676_s13, %s864_s13   ;;  %s636_s12 = sphi %s674_s12, %s863_s12   ;;  %s632_s11 = sphi %s672_s11, %s862_s11   ;;  %s628_s10 = sphi %s670_s10, %s861_s10   ;;  %s624_s9 = sphi %s668_s9, %s860_s9  }
   0x8   : > { %p74_p0 = scmp.ne.s32.totalorder %s628_s10, %s624_s9  ;;  %p702_p1 = scmp.eq.s32.totalorder %s400_s15, 0 }
   0x9   : > { %p706_p2 = scmp.eq.s32.totalorder %s400_s15, 1  ;;  %p106_p3 = scmp.eq.s32.totalorder %s401_s16, 1 }
   0xa   : > { %p712_p4 = por %p702_p1, %p74_p0  ;;  %p402_p5 = scmp.ge.s32.totalorder %s644_s14, 1 }
   0xb   : > { %p717_p6 = por %p106_p3, %p74_p0  ;;  %p113_p7 = scmp.lt.s32.totalorder %s644_s14, 3 }
   0xc   : > { %s851_s19 = scalar_select %p712_p4, 1, 0 }
   0xd   : > { %s852_s20 = scalar_select %p717_p6, 1, 0 }
   0xe   : > { %p722_p8 = pnand %p402_p5, %p113_p7  ;;  %s646_s22 = smov [#allocation4]  }
   0xf   : > { %s126_s23 = sshll.u32 %s646_s22, 4  ;;  %s31_s25 = sadd.s32 1, %s640_s13  ;;  %s127_s23 = int_to_ptr.vmem [resolvable:$true] %s126_s23 }
  0x10   : > { %p437_p10 = pneg %p722_p8  ;;  %s61_s26 = sadd.s32 1, %s632_s11 }
  0x11   : > { %p33_p12 = scmp.ge.s32.totalorder %s31_s25, 2  ;;  %s517_s27 = scalar_lea.vmem %s127_s23, 128 }
  0x12   : > { %p731_p11 = pnand %p437_p10, %p702_p1  ;;  %p518_p0 = scmp.ne.s32.totalorder %s127_s23, %s517_s27 }
  0x13   : > { %p525_p7 = scmp.lt.s32.totalorder %s127_s23, %s127_s23  ;;  %p526_p6 = scmp.lt.s32.totalorder %s517_s27, %s517_s27 }
  0x14   : > { %p508_p13 = pneg %p731_p11 }
  0x15   : > { %p527_p9 = por %p526_p6, %p525_p7 }
  0x16   : > { %p520_p3 = pnand %p518_p0, %p508_p13 }
  0x18   : > { %p521_p5 = pneg %p520_p3 }
  0x1a   : > { %p528_p4 = pnand %p527_p9, %p521_p5 }
  0x1c   : > { %531 = shalt.err (!%p528_p4)
}
  0x1d   : > { %440 = dma.hbm_to_vmem [thread:$0]  (!%p731_p11), %s845_s0, 128, %s127_s23, [#allocation5]  }
  0x1e   : > { %s866_s25 = smov (%p33_p12, %s31_s25), 0  ;;  %p68_p6 = scmp.ne.s32.totalorder %s632_s11, %s628_s10 }
  0x1f   : > { %p69_p4 = scmp.eq.s32.totalorder %s644_s14, 0  ;;  %s56_s30 = ssub.s32 %s640_s13, %s866_s25 }
  0x20   : > { %p450_p9 = scmp.lt.s32.totalorder %s644_s14, 2  ;;  %p59_p10 = scmp.eq.s32.totalorder %s56_s30, 0 }
  0x21   : > { %p70_p13 = por %p69_p4, %p68_p6  ;;  %p754_p0 = por %p706_p2, %p68_p6 }
  0x22   : > { %s137_s4 = sand.u32 1, %s632_s11   ;;  %s406_s7 = sshll.u32 %s640_s13, 7 }
  0x23   : > { %s760_s5 = scalar_select %p59_p10, %s632_s11, %s61_s26  }
  0x24   : > { %s405_s6 = sshll.u32 %s137_s4, 3  ;;  %s147_s16 = scalar_lea.hbm %s846_s1, %s406_s7 }
  0x25   : > { %s141_s22 = scalar_lea.vmem [#allocation7], %s405_s6  ;;  %p766_p11 = pnand %p450_p9, %p70_p13 }
  0x26   : > { %s149_s23 = sshll.u32 %s141_s22, 4  ;;  %s138_s18 = scalar_lea.sflag [#allocation8], %s137_s4  ;;  %s150_s23 = int_to_ptr.vmem [resolvable:$true] %s149_s23 }
  0x27   : > { %p534_p2 = pneg %p766_p11  ;;  %s545_s27 = scalar_lea.vmem %s150_s23, 128 }
  0x28   : > { %p546_p12 = scmp.ne.s32.totalorder %s150_s23, %s545_s27  ;;  %s647_s26 = smov [#allocation7]  }
  0x29   : > { %s550_s28 = sshll.u32 %s647_s26, 4  ;;  %s551_s28 = int_to_ptr.vmem [resolvable:$false] %s550_s28 }
  0x2a   : > { %p548_p3 = pnand %p546_p12, %p534_p2  ;;  %s552_s29 = scalar_lea.vmem %s551_s28, 256 }
  0x2b   : > { %p553_p7 = scmp.lt.s32.totalorder %s150_s23, %s551_s28  ;;  %p554_p6 = scmp.lt.s32.totalorder %s552_s29, %s545_s27 }
  0x2c   : > { %p549_p5 = pneg %p548_p3 }
  0x2d   : > { %p555_p4 = por %p554_p6, %p553_p7 }
  0x2f   : > { %p556_p10 = pnand %p555_p4, %p549_p5 }
  0x31   : > { %559 = shalt.err (!%p556_p10)
}
  0x32   : > { %444 = dma.hbm_to_vmem [thread:$0]  (!%p766_p11), %s147_s16, 128, %s150_s23, %s138_s18  }
  0x33   : > { %158 = sbr.rel (%p722_p8) target bundleno = 393 (0x189), region = 28 }
  0x38   : > { %611 = dma.done.wait (%p702_p1), [#allocation5], 128  }
  0x39   : > { %613 = vsyncadd (%p702_p1), [#allocation5], 4294967168  ;;  %s781_s30 = sand.u32 1, %s628_s10   ;;  %p857_p9 = scmp.ne.s32.totalorder %s851_s19, 0 }
  0x3a   : > { %s409_s4 = sshll.u32 %s781_s30, 3  ;;  %s165_s6 = scalar_lea.sflag [#allocation8], %s781_s30 }
  0x3b   : > { %s168_s7 = scalar_lea.vmem [#allocation7], %s409_s4 }
  0x3c   : > { %615 = dma.done.wait (%p857_p9), %s165_s6, 128  }
  0x3d   : > { %617 = vsyncadd (%p857_p9), %s165_s6, 4294967168  ;;  %v648_v0 = vmov 0.0   ;;  %vm649_vm0 = vmmov 0   ;;  %v189_v1 = vld [vmem:[%s168_s7] sm:$0xff]  ;;  %s650_s17 = smov 4   ;;  %s651_s21 = smov 2   ;;  %v196_v2 = vlaneseq }
  0x3e   : > { %420 = vmatprep.subr.mxu0 %v648_v0  ;;  %426 = vmatprep.mubr.msk.f32.mxu0 %vm649_vm0, %v648_v0  ;;  %v214_v9 = vld [vmem:[#allocation4] sm:$0xff]  ;;  %vm218_vm3 = vcmask 195584   ;;  %s188_s19 = scalar_lea.vmem [#allocation9], %s409_s4  ;;  %s413_s15 = sshll.u32 %s636_s12, 7 }
  0x3f   : > { %198 = vrot.lane.b32.xlu1 %v189_v1, %s650_s17  ;;  %205 = vrot.lane.b32.xlu0 %v189_v1, %s651_s21  ;;  %v197_v3 = vand.u32 127, %v196_v2  ;;  %s308_s8 = sshll.u32 %s188_s19, 4  ;;  %s799_s23 = scalar_lea.hbm %s847_s2, %s413_s15  ;;  %s794_s8 = int_to_ptr.vmem [resolvable:$true] %s308_s8 }
  0x40   : > { %421 = vmatpush3.msra.mxu0 %v189_v1  ;;  %s294_s24 = scalar_lea.sflag [#allocation6], %s781_s30  ;;  %s560_s18 = scalar_lea.vmem %s794_s8, 128 }
  0x41   : > { %422 = vmatprep.subr.mxu0 %v648_v0  ;;  %vm209_vm1 = vcmp.lt.s32.totalorder %v197_v3, 2  ;;  %vm202_vm2 = vcmp.lt.s32.totalorder %v197_v3, 4  ;;  %p561_p1 = scmp.ne.s32.totalorder %s794_s8, %s560_s18  ;;  %s652_s12 = smov [#allocation9]  }
  0x42   : > { %s564_s27 = sshll.u32 %s652_s12, 4  ;;  %s565_s27 = int_to_ptr.vmem [resolvable:$false] %s564_s27 }
  0x43   : > { %200 = vrot.lane.b32.xlu1 %v648_v0, %s650_s17  ;;  %207 = vrot.lane.b32.xlu0 %v648_v0, %s651_s21  ;;  %p562_p8 = pnand %p561_p1, %p754_p0  ;;  %s566_s26 = scalar_lea.vmem %s565_s27, 256 }
  0x44   : > { %p567_p11 = scmp.lt.s32.totalorder %s794_s8, %s565_s27  ;;  %p568_p2 = scmp.lt.s32.totalorder %s566_s26, %s560_s18 }
  0x45   : > { %p563_p13 = pneg %p562_p8 }
  0x46   : > { %p569_p12 = por %p568_p2, %p567_p11 }
  0x48   : > { %p570_p3 = pnand %p569_p12, %p563_p13 }
  0xb1   : > { %v199_v4 = vpop.permute.xlu1 %198  ;;  %v206_v5 = vpop.permute.xlu0 %205 }
  0xb5   : > { %v201_v6 = vpop.permute.xlu1 %200  ;;  %v208_v7 = vpop.permute.xlu0 %207 }
  0xb6   : > { %v210_v8 = vsel %vm209_vm1, %v208_v7, %v206_v5  ;;  %v203_v10 = vsel %vm202_vm2, %v201_v6, %v199_v4 }
  0xb7   : > { %423 = vmatpush3.msra.mxu0 %v210_v8 }
  0xb8   : > { %424 = vmatprep.subr.mxu0 %v648_v0 }
  0xb9   : > { %425 = vmatpush3.msra.mxu0 %v203_v10 }
  0xba   : > { %427 = vmatmul.mubr.msk.f32.vlgmr.msra.gmra.mxu0 %vm218_vm3, %v214_v9 }
 0x17a   : > { %v288_v11 = vpop.f32.mrf.mxu0 }
 0x17b   : > { %292 = vst [vmem:[%s188_s19] sm:$0xff] %v288_v11 }
 0x17c   : > { %v428_v12 = vpop.f32.mrf.mxu0 }
 0x17d   : > { %573 = shalt.err (!%p570_p3)
}
 0x17e   : > { %s574_s28 = scalar_lea.hbm %s799_s23, 128  ;;  %s578_s4 = scalar_lea.hbm %s847_s2, 256 }
 0x17f   : > { %p575_p5 = scmp.ne.s32.totalorder %s799_s23, %s574_s28  ;;  %p579_p4 = scmp.lt.s32.totalorder %s799_s23, %s847_s2 }
 0x180   : > { %p580_p10 = scmp.lt.s32.totalorder %s578_s4, %s574_s28 }
 0x181   : > { %p576_p7 = pnand %p575_p5, %p754_p0 }
 0x182   : > { %p581_p9 = por %p580_p10, %p579_p4 }
 0x183   : > { %p577_p6 = pneg %p576_p7 }
 0x185   : > { %p582_p1 = pnand %p581_p9, %p577_p6 }
 0x187   : > { %585 = shalt.err (!%p582_p1)
}
 0x188   : > { %435 = dma.vmem_to_hbm [thread:$0]  (%p754_p0), %s794_s8, 128, %s799_s23, %s294_s24  }
 0x189 PF: > { %s320_s17 = sand.u32 1, %s624_s9   ;;  %p858_p8 = scmp.ne.s32.totalorder %s852_s20, 0 }
 0x18a   : > { %p859_p13 = scmp.ge.s32.totalorder %s644_s14, 2  ;;  %s321_s21 = scalar_lea.sflag [#allocation6], %s320_s17 }
 0x18c   : > { %p446_p11 = pnand %p859_p13, %p858_p8 }
 0x18e   : > { %p447_p2 = pneg %p446_p11 }
 0x190   : > { %619 = dma.done.wait (%p447_p2), %s321_s21, 128  }
 0x191   : > { %621 = vsyncadd (%p447_p2), %s321_s21, 4294967168  ;;  %s19_s14 = sadd.s32 1, %s644_s14   ;;  %s860_s9 = smov %s628_s10 }
 0x192   : > { %p16_p12 = scmp.ge.s32.totalorder %s19_s14, 4   ;;  %s861_s10 = smov %s632_s11 }
 0x193   : > { %s862_s11 = smov %s760_s5  ;;  %s863_s12 = smov %s640_s13 }
 0x194   : > { %s864_s13 = smov %s866_s25  ;;  %18 = sbr.rel (!%p16_p12) target bundleno = 7 (0x7), region = 82 }
 0x199   :  { %326 = vsyncpa [#allocation5], 1 }
 0x19a   :  { %328 = vsyncpa [#allocation5 + $0x1], 1 }
 0x19b   :  { %329 = vsyncpa [#allocation8], 1 }
 0x19c   :  { %331 = vsyncpa [#allocation8 + $0x1], 1 }
 0x19d   :  { %332 = vsyncpa [#allocation6], 1 }
 0x19e   :  { %334 = vsyncpa [#allocation6 + $0x1], 1 }

</bundles_post_ra>
